<compile_context>
chip_gen: v5e
topology: v5e:2x2
jax: 0.10.0
libtpu: 0.0.40
codegen_flags: <defaults>
</compile_context>

<pallas_src>
import functools

import jax
import jax.numpy as jnp
from jax.experimental import pallas as pl
from jax.experimental.pallas import tpu as pltpu

_LANE = 128


def _round_up(n, m):
    return ((n + m - 1) // m) * m


def _pad_to(a, shape):
    return jnp.pad(a, [(0, s - d) for d, s in zip(a.shape, shape)])


def _vmem_params():
    """Generation-aware VMEM sizing (v5e/v6e: 128 MiB, v7x: 64 MiB per TensorCore)."""
    cap = 64 << 20  # conservative default (v7x per-TC) if the query fails
    try:
        info = pltpu.get_tpu_info()
        cap = int(getattr(info, "vmem_capacity_bytes", cap))
    except Exception:
        pass
    budget = int(cap * 0.40)                  # per-step activation working set
    limit = min(int(cap * 0.75), 100 << 20)   # scoped-VMEM request
    tb_cap = 512 if cap >= (96 << 20) else 256
    return budget, limit, tb_cap


def _choose_batch_tile(batch, dma_row_bytes, compute_row_bytes, budget, tb_cap):
    """Largest batch tile (multiple of 8) whose per-step VMEM use (double-buffered DMA
    blocks + f32 intermediates) fits the budget; prefer >=2 grid steps so pipelining and
    multi-TC sharding (v7x) can kick in."""
    per_row = 2 * dma_row_bytes + compute_row_bytes
    tb = tb_cap
    while tb > 8 and tb * per_row > budget:
        tb //= 2
    tb = min(max(tb, 8), _round_up(batch, 8))
    while _round_up(batch, tb) // tb < 2 and tb > 8 and (tb // 2) % 8 == 0:
        tb //= 2
    return tb


# ----------------------------- Pallas kernels ------------------------------ #

def _ehr_fused_kernel(x_ref, mask_ref, w_enc_ref, b_enc_ref, w_cls_ref, b_cls_ref, out_ref):
    """Fused EHR encoder (Linear+ReLU), length-masked mean pool over time, classifier.

    x_ref    : [TB, T, F] f32  (true feature dim, cast to bf16 in-kernel for the MXU)
    mask_ref : [TB*T, 1]  f32  (validity * 1/seq_len, flattened -> pure lane splat)
    weights  : bf16 matmul operands / f32 biases, VMEM-resident (constant index_maps)
    out_ref  : [TB, Cp]   f32  (lane-dense: Cp is 128-padded, sliced in the wrapper)
    """
    tb, t, f = x_ref.shape
    x2d = x_ref[...].reshape(tb * t, f).astype(jnp.bfloat16)
    # [TB*T, F] @ [F, H] -> f32 accumulation on the MXU (bf16 operands).
    h = jnp.dot(x2d, w_enc_ref[...], preferred_element_type=jnp.float32)
    h = jnp.maximum(h + b_enc_ref[...], 0.0)          # f32 elementwise (VPU)
    h = h * mask_ref[...]                              # mask already carries 1/seq_len
    feats = jnp.sum(h.reshape(tb, t, h.shape[-1]), axis=1)      # [TB, H] f32
    out_ref[...] = (jnp.dot(feats.astype(jnp.bfloat16), w_cls_ref[...],
                            preferred_element_type=jnp.float32) + b_cls_ref[...])


def _rr_fused_kernel(tok_ref, w_fused_ref, b_fused_ref, out_ref, *, pool_cls):
    """RR path with encoder + pool + classifier folded into one small matmul.

      pool_S(tok @ W_txt + b_txt) @ W_cls + b_cls
        == pool_S(tok) @ (W_txt @ W_cls) + (b_txt @ W_cls + b_cls)

    so the kernel is: sequence pool + one [TB, E] x [E, Cp] bf16 matmul.
    """
    if pool_cls:
        # TODO(synk): a (TB, 1, E) BlockSpec reading only token 0 would avoid DMA-ing
        # the non-cls tokens; kept full-S here for layout safety of the toy shapes.
        pooled = tok_ref[:, 0, :]
    else:
        pooled = jnp.mean(tok_ref[...], axis=1)        # [TB, E] f32
    out_ref[...] = (jnp.dot(pooled.astype(jnp.bfloat16), w_fused_ref[...],
                            preferred_element_type=jnp.float32) + b_fused_ref[...])


# ----------------------------- jitted wrappers ------------------------------ #

@functools.partial(jax.jit, static_argnames=("num_classes",))
def _ehr_forward_impl(x, seq_lengths, w_enc, b_enc, w_cls, b_cls, num_classes):
    B, T, F = x.shape
    H = w_enc.shape[1]
    Cp = w_cls.shape[1]          # already lane-padded at parameter-load time

    budget, vlimit, tb_cap = _vmem_params()
    dma_row = T * F * 4 + T * 4 + Cp * 4                 # x + mask + out per batch row
    comp_row = T * F * 2 + T * H * 6 + H * 8             # bf16 x copy, f32 h, feats
    TB = _choose_batch_tile(B, dma_row, comp_row, budget, tb_cap)
    Bp = _round_up(B, TB)

    x_p = _pad_to(x.astype(jnp.float32), (Bp, T, F))

    # Validity mask scaled by 1/seq_len (guards seq_len == 0), flattened to [Bp*T, 1].
    sl = seq_lengths.astype(jnp.float32).reshape(B, 1)
    inv = 1.0 / jnp.maximum(sl, 1.0)
    mask = (jnp.arange(T, dtype=jnp.float32)[None, :] < sl).astype(jnp.float32) * inv
    mask = _pad_to(mask, (Bp, T)).reshape(Bp * T, 1)

    out = pl.pallas_call(
        _ehr_fused_kernel,
        out_shape=jax.ShapeDtypeStruct((Bp, Cp), jnp.float32),
        grid=(Bp // TB,),
        in_specs=[
            pl.BlockSpec((TB, T, F), lambda b: (b, 0, 0)),     # full-extent last dims
            pl.BlockSpec((TB * T, 1), lambda b: (b, 0)),
            pl.BlockSpec((F, H), lambda b: (0, 0)),            # weights: VMEM-resident
            pl.BlockSpec((1, H), lambda b: (0, 0)),
            pl.BlockSpec((H, Cp), lambda b: (0, 0)),
            pl.BlockSpec((1, Cp), lambda b: (0, 0)),
        ],
        out_specs=pl.BlockSpec((TB, Cp), lambda b: (b, 0)),
        compiler_params=pltpu.CompilerParams(
            dimension_semantics=("parallel",),
            vmem_limit_bytes=vlimit,
        ),
    )(x_p, mask, w_enc, b_enc, w_cls, b_cls)
    return out[:B, :num_classes]


@functools.partial(jax.jit, static_argnames=("use_cls", "num_classes"))
def _rr_forward_impl(tok, w_fused, b_fused, use_cls, num_classes):
    B, S, E = tok.shape
    Cp = w_fused.shape[1]        # already lane-padded at parameter-load time

    budget, vlimit, tb_cap = _vmem_params()
    dma_row = S * E * 4 + Cp * 4
    comp_row = E * 8
    TB = _choose_batch_tile(B, dma_row, comp_row, budget, tb_cap)
    Bp = _round_up(B, TB)

    tok_p = _pad_to(tok.astype(jnp.float32), (Bp, S, E))

    out = pl.pallas_call(
        functools.partial(_rr_fused_kernel, pool_cls=use_cls),
        out_shape=jax.ShapeDtypeStruct((Bp, Cp), jnp.float32),
        grid=(Bp // TB,),
        in_specs=[
            pl.BlockSpec((TB, S, E), lambda b: (b, 0, 0)),     # full-extent last dims
            pl.BlockSpec((E, Cp), lambda b: (0, 0)),
            pl.BlockSpec((1, Cp), lambda b: (0, 0)),
        ],
        out_specs=pl.BlockSpec((TB, Cp), lambda b: (b, 0)),
        compiler_params=pltpu.CompilerParams(
            dimension_semantics=("parallel",),
            vmem_limit_bytes=vlimit,
        ),
    )(tok_p, w_fused, b_fused)
    return out[:B, :num_classes]


# -------------------------- parameter preparation --------------------------- #

def prepare_ehr_params(p):
    F, H = p["w_enc"].shape
    C = p["w_cls"].shape[1]
    Cp = _round_up(C, _LANE)
    return {
        "w_enc": jnp.asarray(p["w_enc"], jnp.bfloat16),
        "b_enc": jnp.asarray(p["b_enc"], jnp.float32).reshape(1, H),
        "w_cls": _pad_to(jnp.asarray(p["w_cls"], jnp.bfloat16), (H, Cp)),
        "b_cls": _pad_to(jnp.asarray(p["b_cls"], jnp.float32).reshape(1, C), (1, Cp)),
        "num_classes": C,
    }


def prepare_rr_params(p):
    # Fold encoder + pool + classifier ONCE at parameter-load time (valid because the
    # synthesized text encoder is purely affine and pooling commutes with affine maps).
    w_txt = jnp.asarray(p["w_txt"], jnp.float32)
    b_txt = jnp.asarray(p["b_txt"], jnp.float32).reshape(1, -1)
    w_cls = jnp.asarray(p["w_cls"], jnp.float32)
    b_cls = jnp.asarray(p["b_cls"], jnp.float32).reshape(1, -1)
    E = w_txt.shape[0]
    C = w_cls.shape[1]
    Cp = _round_up(C, _LANE)
    return {
        "w_fused": _pad_to((w_txt @ w_cls).astype(jnp.bfloat16), (E, Cp)),
        "b_fused": _pad_to(b_txt @ w_cls + b_cls, (1, Cp)),
        "num_classes": C,
    }


def ehr_forward_pallas(x, seq_lengths, prepped):
    out = _ehr_forward_impl(x, seq_lengths, prepped["w_enc"], prepped["b_enc"],
                            prepped["w_cls"], prepped["b_cls"],
                            num_classes=prepped["num_classes"])
    return {"unimodal_ehr": out, "unified": out}


def rr_forward_pallas(rr_tokens, prepped, use_cls_token="mean"):
    out = _rr_forward_impl(rr_tokens, prepped["w_fused"], prepped["b_fused"],
                           use_cls=(use_cls_token == "cls"),
                           num_classes=prepped["num_classes"])
    return {"unimodal_rr": out, "unified": out}


class FusionPallas:
    """Mirror of the PyTorch `Fusion` dispatch."""

    def __init__(self, args, ehr_params=None, text_params=None):
        self.args = args
        assert "modalities" in args, "args.modalities is required"
        self.fusion_type = args["fusion_type"]
        if self.fusion_type == "unimodal_ehr":
            if ehr_params is None:
                raise ValueError("EHR encoder must be provided for UnimodalEHR!")
            self.params = prepare_ehr_params(ehr_params)
        elif self.fusion_type == "unimodal_rr":
            if text_params is None or "RR" not in args["modalities"]:
                raise ValueError("Text encoder with 'RR' modality required for UnimodalRR!")
            self.params = prepare_rr_params(text_params)
        else:
            raise ValueError(f"Unknown fusion type: {self.fusion_type}")

    def __call__(self, x=None, seq_lengths=None, img=None, pairs=None, rr=None, dn=None):
        if self.fusion_type == "unimodal_ehr":
            if x is None:
                raise ValueError("EHR data (x) must be provided for UnimodalEHR!")
            return ehr_forward_pallas(x, seq_lengths, self.params)
        else:
            if rr is None:
                raise ValueError("RR data (rr) must be provided for UnimodalRR!")
            return rr_forward_pallas(rr, self.params,
                                     self.args.get("use_cls_token", "mean"))


# ------------------------------ reference (JAX, f32) ------------------------ #

def ehr_forward_ref(x, seq_lengths, p):
    h = jnp.maximum(jnp.einsum("btf,fh->bth", x, p["w_enc"]) + p["b_enc"], 0.0)
    B, T, _ = x.shape
    sl = seq_lengths.astype(jnp.float32).reshape(B, 1)
    mask = (jnp.arange(T, dtype=jnp.float32)[None, :] < sl).astype(jnp.float32)
    feats = jnp.sum(h * mask[:, :, None], axis=1) / sl
    return feats @ p["w_cls"] + p["b_cls"]


def rr_forward_ref(tok, p, use_cls_token="mean"):
    rr_feats = jnp.einsum("bse,ed->bsd", tok, p["w_txt"]) + p["b_txt"]
    pooled = rr_feats[:, 0, :] if use_cls_token == "cls" else rr_feats.mean(axis=1)
    return pooled @ p["w_cls"] + p["b_cls"]


# ---------------------------------- main ------------------------------------ #

if __name__ == "__main__":
    key = jax.random.PRNGKey(0)
    B, T, F, H, C = 2, 8, 16, 32, 4      # EHR: batch, time, features, feats_dim, classes
    S, E, D = 8, 16, 32                  # RR : seq, embed dim, feats_dim_rr

    ks = jax.random.split(key, 10)
    ehr_params = {
        "w_enc": jax.random.normal(ks[0], (F, H), jnp.float32) * 0.1,
        "b_enc": jax.random.normal(ks[1], (1, H), jnp.float32) * 0.1,
        "w_cls": jax.random.normal(ks[2], (H, C), jnp.float32) * 0.1,
        "b_cls": jax.random.normal(ks[3], (1, C), jnp.float32) * 0.1,
    }
    text_params = {
        "w_txt": jax.random.normal(ks[4], (E, D), jnp.float32) * 0.1,
        "b_txt": jax.random.normal(ks[5], (1, D), jnp.float32) * 0.1,
        "w_cls": jax.random.normal(ks[6], (D, C), jnp.float32) * 0.1,
        "b_cls": jax.random.normal(ks[7], (1, C), jnp.float32) * 0.1,
    }

    x = jax.random.normal(ks[8], (B, T, F), jnp.float32)
    seq_lengths = jnp.array([T, T - 3], dtype=jnp.int32)
    rr_tokens = jax.random.normal(ks[9], (B, S, E), jnp.float32)

    args_ehr = {"modalities": ["EHR"], "fusion_type": "unimodal_ehr", "use_cls_token": "mean"}
    args_rr = {"modalities": ["RR"], "fusion_type": "unimodal_rr", "use_cls_token": "mean"}
    args_rr_cls = {"modalities": ["RR"], "fusion_type": "unimodal_rr", "use_cls_token": "cls"}

    # unimodal_ehr path
    fusion_ehr = FusionPallas(args_ehr, ehr_params=ehr_params)
    out_ehr = fusion_ehr(x=x, seq_lengths=seq_lengths)
    jax.block_until_ready(out_ehr["unified"])
    ref_ehr = ehr_forward_ref(x, seq_lengths, ehr_params)
    # activations pass through the MXU in bf16 -> compare against the f32 reference
    # with a bf16-appropriate tolerance.
    assert jnp.allclose(out_ehr["unimodal_ehr"], ref_ehr, atol=2e-2, rtol=2e-2)
    assert jnp.allclose(out_ehr["unified"], ref_ehr, atol=2e-2, rtol=2e-2)

    # unimodal_rr path (mean pooling)
    # TODO(synk): the real text_model is a pretrained transformer not present in the
    # snippet; here it is synthesized as a per-token linear projection producing rr_feats.
    fusion_rr = FusionPallas(args_rr, text_params=text_params)
    out_rr = fusion_rr(rr=rr_tokens)
    jax.block_until_ready(out_rr["unified"])
    ref_rr = rr_forward_ref(rr_tokens, text_params, "mean")
    assert jnp.allclose(out_rr["unimodal_rr"], ref_rr, atol=2e-2, rtol=2e-2)
    assert jnp.allclose(out_rr["unified"], ref_rr, atol=2e-2, rtol=2e-2)

    # unimodal_rr path ('cls' token pooling)
    fusion_rr_cls = FusionPallas(args_rr_cls, text_params=text_params)
    out_rr_cls = fusion_rr_cls(rr=rr_tokens)
    jax.block_until_ready(out_rr_cls["unified"])
    ref_rr_cls = rr_forward_ref(rr_tokens, text_params, "cls")
    assert jnp.allclose(out_rr_cls["unimodal_rr"], ref_rr_cls, atol=2e-2, rtol=2e-2)
    assert jnp.allclose(out_rr_cls["unified"], ref_rr_cls, atol=2e-2, rtol=2e-2)

    print("KERNEL_OK")
</pallas_src>

<mosaic_0001>
module attributes {stable_mosaic.version = 11 : i64} {
  func.func @_ehr_fused_kernel(%arg0: i32, %arg1: memref<8x8x16xf32, #tpu.memory_space<vmem>>, %arg2: memref<64x1xf32, #tpu.memory_space<vmem>>, %arg3: memref<16x32xbf16, #tpu.memory_space<vmem>>, %arg4: memref<1x32xf32, #tpu.memory_space<vmem>>, %arg5: memref<32x128xbf16, #tpu.memory_space<vmem>>, %arg6: memref<1x128xf32, #tpu.memory_space<vmem>>, %arg7: memref<8x128xf32, #tpu.memory_space<vmem>>) attributes {dimension_semantics = [#tpu.dimension_semantics<parallel>], iteration_bounds = array<i64: 1>, scalar_prefetch = 0 : i64, scratch_operands = 0 : i64, tpu.core_type = #tpu.core_type<tc>, window_params = [{transform_indices = @transform_0, window_bounds = array<i64: 8, 8, 16>}, {transform_indices = @transform_1, window_bounds = array<i64: 64, 1>}, {pipeline_mode = #tpu.pipeline_mode<synchronous>, transform_indices = @transform_2, window_bounds = array<i64: 16, 32>}, {pipeline_mode = #tpu.pipeline_mode<synchronous>, transform_indices = @transform_3, window_bounds = array<i64: 1, 32>}, {pipeline_mode = #tpu.pipeline_mode<synchronous>, transform_indices = @transform_4, window_bounds = array<i64: 32, 128>}, {pipeline_mode = #tpu.pipeline_mode<synchronous>, transform_indices = @transform_5, window_bounds = array<i64: 1, 128>}, {transform_indices = @transform_6, window_bounds = array<i64: 8, 128>}]} {
    %c0 = arith.constant 0 : index
    %c0_0 = arith.constant 0 : index
    %c0_1 = arith.constant 0 : index
    %0 = vector.load %arg1[%c0, %c0_0, %c0_1] : memref<8x8x16xf32, #tpu.memory_space<vmem>>, vector<8x8x16xf32>
    %1 = vector.shape_cast %0 : vector<8x8x16xf32> to vector<64x16xf32>
    %2 = arith.truncf %1 : vector<64x16xf32> to vector<64x16xbf16>
    %c0_2 = arith.constant 0 : index
    %c0_3 = arith.constant 0 : index
    %3 = vector.load %arg3[%c0_2, %c0_3] : memref<16x32xbf16, #tpu.memory_space<vmem>>, vector<16x32xbf16>
    %cst = arith.constant dense<0.000000e+00> : vector<64x32xf32>
    %4 = tpu.matmul %2, %3, %cst {dimension_numbers = #tpu.dot_dimension_numbers<[1], [0], [0], [1], [0, 0, 1, 1], [], []>} : vector<64x16xbf16>, vector<16x32xbf16>, vector<64x32xf32> -> vector<64x32xf32>
    %c0_4 = arith.constant 0 : index
    %c0_5 = arith.constant 0 : index
    %5 = vector.load %arg4[%c0_4, %c0_5] : memref<1x32xf32, #tpu.memory_space<vmem>>, vector<1x32xf32>
    %6 = vector.broadcast %5 : vector<1x32xf32> to vector<64x32xf32>
    %7 = arith.addf %4, %6 : vector<64x32xf32>
    %cst_6 = arith.constant 0.000000e+00 : f32
    %8 = vector.broadcast %cst_6 : f32 to vector<64x32xf32>
    %9 = arith.maximumf %7, %8 : vector<64x32xf32>
    %c0_7 = arith.constant 0 : index
    %c0_8 = arith.constant 0 : index
    %10 = vector.load %arg2[%c0_7, %c0_8] : memref<64x1xf32, #tpu.memory_space<vmem>>, vector<64x1xf32>
    %11 = vector.broadcast %10 : vector<64x1xf32> to vector<64x32xf32>
    %12 = arith.mulf %9, %11 : vector<64x32xf32>
    %13 = vector.shape_cast %12 : vector<64x32xf32> to vector<8x8x32xf32>
    %cst_9 = arith.constant dense<0.000000e+00> : vector<8x32xf32>
    %14 = vector.multi_reduction <add>, %13, %cst_9 [1] : vector<8x8x32xf32> to vector<8x32xf32>
    %15 = arith.truncf %14 : vector<8x32xf32> to vector<8x32xbf16>
    %c0_10 = arith.constant 0 : index
    %c0_11 = arith.constant 0 : index
    %16 = vector.load %arg5[%c0_10, %c0_11] : memref<32x128xbf16, #tpu.memory_space<vmem>>, vector<32x128xbf16>
    %cst_12 = arith.constant dense<0.000000e+00> : vector<8x128xf32>
    %17 = tpu.matmul %15, %16, %cst_12 {dimension_numbers = #tpu.dot_dimension_numbers<[1], [0], [0], [1], [0, 0, 1, 1], [], []>} : vector<8x32xbf16>, vector<32x128xbf16>, vector<8x128xf32> -> vector<8x128xf32>
    %c0_13 = arith.constant 0 : index
    %c0_14 = arith.constant 0 : index
    %18 = vector.load %arg6[%c0_13, %c0_14] : memref<1x128xf32, #tpu.memory_space<vmem>>, vector<1x128xf32>
    %19 = vector.broadcast %18 : vector<1x128xf32> to vector<8x128xf32>
    %20 = arith.addf %17, %19 : vector<8x128xf32>
    %c0_15 = arith.constant 0 : index
    %c0_16 = arith.constant 0 : index
    %21 = vector.load %arg7[%c0_15, %c0_16] : memref<8x128xf32, #tpu.memory_space<vmem>>, vector<8x128xf32>
    tpu.vector_store %arg7[%c0_15, %c0_16], %20 {strides = array<i32>} : memref<8x128xf32, #tpu.memory_space<vmem>>, vector<8x128xf32>,
    return
  }
  func.func @transform_0(%arg0: i32) -> (i32, i32, i32) {
    %c0_i32 = arith.constant 0 : i32
    %c0_i32_0 = arith.constant 0 : i32
    %c0_i32_1 = arith.constant 0 : i32
    return %arg0, %c0_i32, %c0_i32_0 : i32, i32, i32
  }
  func.func @transform_1(%arg0: i32) -> (i32, i32) {
    %c0_i32 = arith.constant 0 : i32
    %c0_i32_0 = arith.constant 0 : i32
    return %arg0, %c0_i32 : i32, i32
  }
  func.func @transform_2(%arg0: i32) -> (i32, i32) {
    %c0_i32 = arith.constant 0 : i32
    %c0_i32_0 = arith.constant 0 : i32
    %c0_i32_1 = arith.constant 0 : i32
    return %c0_i32, %c0_i32_0 : i32, i32
  }
  func.func @transform_3(%arg0: i32) -> (i32, i32) {
    %c0_i32 = arith.constant 0 : i32
    %c0_i32_0 = arith.constant 0 : i32
    %c0_i32_1 = arith.constant 0 : i32
    return %c0_i32, %c0_i32_0 : i32, i32
  }
  func.func @transform_4(%arg0: i32) -> (i32, i32) {
    %c0_i32 = arith.constant 0 : i32
    %c0_i32_0 = arith.constant 0 : i32
    %c0_i32_1 = arith.constant 0 : i32
    return %c0_i32, %c0_i32_0 : i32, i32
  }
  func.func @transform_5(%arg0: i32) -> (i32, i32) {
    %c0_i32 = arith.constant 0 : i32
    %c0_i32_0 = arith.constant 0 : i32
    %c0_i32_1 = arith.constant 0 : i32
    return %c0_i32, %c0_i32_0 : i32, i32
  }
  func.func @transform_6(%arg0: i32) -> (i32, i32) {
    %c0_i32 = arith.constant 0 : i32
    %c0_i32_0 = arith.constant 0 : i32
    return %arg0, %c0_i32 : i32, i32
  }
}

</mosaic_0001>

<bundles_post_ra>
// kernel: _ehr_forward_impl.1
= control target key start
LH: loop header
LB: loop body
LE: loop exit
PB: predicated region body
PF: predicated region fallthrough
CT: control target
= control target key end

     0   :  { %v319_v3 = vmov 0   ;;  %vm48_vm0 = vcmask 130048   ;;  %vm154_vm1 = vcmask 261120   ;;  %vm243_vm2 = vcmask 1041409   ;;  %s444_s2 = inlined_call_operand.vmem [shape: bf16[16,32], index: 2, kind: input, shape index: {}]   ;;  %s445_s0 = inlined_call_operand.vmem [shape: f32[8,8,16], index: 0, kind: input, shape index: {}]   ;;  %s446_s1 = inlined_call_operand.vmem [shape: f32[64,1], index: 1, kind: input, shape index: {}]   ;;  %s447_s3 = inlined_call_operand.vmem [shape: f32[1,32], index: 3, kind: input, shape index: {}]   ;;  %s448_s5 = inlined_call_operand.vmem [shape: f32[1,128], index: 5, kind: input, shape index: {}]   ;;  %s449_s4 = inlined_call_operand.vmem [shape: bf16[32,128], index: 4, kind: input, shape index: {}]   ;;  %s450_s6 = inlined_call_operand.vmem [shape: f32[8,128], index: 6, kind: output, shape index: {}]  }
   0x1   :  { %v308_v0 = vld [vmem:[%s444_s2] sm:$0xff]  ;;  %v25_v2 = vld [vmem:[%s445_s0 + $0x8] sm:$0xff]  ;;  %314 = vset.pattern.permute.xlu0 %v319_v3  ;;  %315 = vset.pattern.permute.xlu1 %v319_v3  ;;  %v26_v5 = vld [vmem:[%s445_s0 + $0x10] sm:$0xff]  ;;  %vm245_vm3 = vcmask 1042434   ;;  %vm247_vm4 = vcmask 1043459   ;;  %vm249_vm5 = vcmask 1044484  }
   0x2   :  { %v24_v1 = vld [vmem:[%s445_s0] sm:$0xff]  ;;  %v27_v6 = vld [vmem:[%s445_s0 + $0x18] sm:$0xff]  ;;  %v30_v7 = vld [vmem:[%s445_s0 + $0x30] sm:$0xff]  ;;  %316 = vset.pattern.permute.xlu2 %v319_v3  ;;  %68 = vmatpush.bf16.msra.mxu0 %v308_v0  ;;  %vm251_vm6 = vcmask 1045509   ;;  %vm253_vm7 = vcmask 1046534   ;;  %vm255_vm8 = vcmask 1047559  }
   0x3   :  { %v32_v4 = vpack.c.bf16 %v25_v2, %v24_v1  ;;  %311 = vmatpush.bf16.msra.mxu2 %v308_v0  ;;  %v33_v8 = vpack.c.bf16 %v27_v6, %v26_v5  ;;  %v31_v9 = vld [vmem:[%s445_s0 + $0x38] sm:$0xff]  ;;  %v98_v10 = vld [vmem:[%s446_s1] sm:$0xff]  ;;  %v100_v11 = vld [vmem:[%s446_s1 + $0x10] sm:$0xff]  ;;  %312 = vmatpush.bf16.msra.mxu3 %v308_v0 }
   0x4   :  { %v35_v12 = vpack.c.bf16 %v31_v9, %v30_v7  ;;  %108 = vperm.xlu0 %314, %v98_v10   ;;  %118 = vperm.xlu1 %315, %v100_v11   ;;  %v102_v13 = vld [vmem:[%s446_s1 + $0x20] sm:$0xff]  ;;  %v99_v14 = vld [vmem:[%s446_s1 + $0x8] sm:$0xff]  ;;  %v101_v15 = vld [vmem:[%s446_s1 + $0x18] sm:$0xff] }
   0x5   :  { %295 = vmatmul.msk.bf16.vlgmr.msra.gmra.mxu0 %vm48_vm0, %v32_v4  ;;  %128 = vperm.xlu2 %316, %v102_v13   ;;  %v103_v16 = vld [vmem:[%s446_s1 + $0x28] sm:$0xff]  ;;  %v28_v17 = vld [vmem:[%s445_s0 + $0x20] sm:$0xff]  ;;  %v104_v19 = vld [vmem:[%s446_s1 + $0x30] sm:$0xff] }
   0x6   :  { %296 = vmatmul.msk.bf16.vlgmr.msra.gmra.mxu2 %vm48_vm0, %v33_v8  ;;  %298 = vmatmul.msk.bf16.vlgmr.msra.gmra.mxu3 %vm48_vm0, %v35_v12  ;;  %v29_v18 = vld [vmem:[%s445_s0 + $0x28] sm:$0xff]  ;;  %v105_v21 = vld [vmem:[%s446_s1 + $0x38] sm:$0xff]  ;;  %v413_v24 = vld [vmem:[%s447_s3] ss:$0 sm:$0xff] }
   0x7   :  { %v34_v20 = vpack.c.bf16 %v29_v18, %v28_v17  ;;  %v310_v60 = vld [vmem:[%s449_s4 + $0x8] sm:$0xff]  ;;  %v309_v2 = vld [vmem:[%s449_s4] sm:$0xff] }
   0x8   :  { %279 = vmatpush.bf16.msra.mxu1 %v310_v60 }
   0xc   :  { %113 = vperm.xlu0 %314, %v99_v14   ;;  %123 = vperm.xlu1 %315, %v101_v15  }
   0xd   :  { %133 = vperm.xlu2 %316, %v103_v16   ;;  %280 = vmatpush.bf16.msra.mxu1 %v309_v2 }
  0x14   :  { %138 = vperm.xlu0 %314, %v104_v19   ;;  %143 = vperm.xlu1 %315, %v105_v21  }
  0x16   :  { %297 = vmatmul.msk.bf16.gmra.mxu2 %vm48_vm0, %v34_v20 }
  0x5f   :  { %v129_v8 = vpop.permute.xlu2 %128 }
  0x76   :  { %v109_v22 = vpop.permute.xlu0 %108  ;;  %v119_v23 = vpop.permute.xlu1 %118 }
  0x7e   :  { %v114_v28 = vpop.permute.xlu0 %113  ;;  %v124_v32 = vpop.permute.xlu1 %123 }
  0x82   :  { %v70_v25 = vpop.f32.mrf.mxu0 }
  0x83   :  { %v71_v26 = vadd.f32 %v413_v24, %v70_v25 }
  0x85   :  { %v90_v27 = vmax.f32 %v71_v26, 0.0 }
  0x86   :  { %v139_v45 = vpop.permute.xlu0 %138  ;;  %v144_v52 = vpop.permute.xlu1 %143 }
  0x87   :  { %v146_v34 = vmul.f32 %v109_v22, %v90_v27 }
  0x89   :  { %v75_v29 = vpop.f32.mrf.mxu2  ;;  %v85_v31 = vpop.f32.mrf.mxu3  ;;  %v155_v39 = vsel %vm154_vm1, %v146_v34, 0.0 }
  0x8a   :  { %v76_v30 = vadd.f32 %v413_v24, %v75_v29  ;;  %v72_v33 = vpop.f32.mrf.mxu0  ;;  %v86_v37 = vadd.f32 %v413_v24, %v85_v31  ;;  %v156_v48 = vrot.slane %v155_v39, 4  ;;  %v134_v34 = vpop.permute.xlu2 %133 }
  0x8b   :  { %v73_v35 = vadd.f32 %v413_v24, %v72_v33 }
  0x8c   :  { %v92_v36 = vmax.f32 %v76_v30, 0.0  ;;  %v96_v42 = vmax.f32 %v86_v37, 0.0  ;;  %v157_v57 = vadd.f32 %v156_v48, %v155_v39 }
  0x8d   :  { %v91_v38 = vmax.f32 %v73_v35, 0.0 }
  0x8e   :  { %v148_v41 = vmul.f32 %v119_v23, %v92_v36  ;;  %v152_v54 = vmul.f32 %v139_v45, %v96_v42  ;;  %v158_v5 = vrot.slane %v157_v57, 2 }
  0x8f   :  { %v147_v40 = vmul.f32 %v114_v28, %v91_v38 }
  0x90   :  { %v169_v53 = vsel %vm154_vm1, %v148_v41, 0.0  ;;  %v197_v63 = vsel %vm154_vm1, %v152_v54, 0.0  ;;  %v159_v14 = vadd.f32 %v158_v5, %v157_v57 }
  0x91   :  { %v77_v43 = vpop.f32.mrf.mxu2  ;;  %v162_v44 = vsel %vm154_vm1, %v147_v40, 0.0  ;;  %v87_v47 = vpop.f32.mrf.mxu3  ;;  %v170_v61 = vrot.slane %v169_v53, 4  ;;  %v198_v10 = vrot.slane %v197_v63, 4 }
  0x92   :  { %v78_v46 = vadd.f32 %v413_v24, %v77_v43  ;;  %v163_v49 = vrot.slane %v162_v44, 4  ;;  %v88_v50 = vadd.f32 %v413_v24, %v87_v47  ;;  %v160_v25 = vrot.slane %v159_v14, 1 }
  0x93   :  { %v171_v9 = vadd.f32 %v170_v61, %v169_v53  ;;  %v199_v18 = vadd.f32 %v198_v10, %v197_v63 }
  0x94   :  { %v93_v51 = vmax.f32 %v78_v46, 0.0  ;;  %v97_v55 = vmax.f32 %v88_v50, 0.0  ;;  %v164_v58 = vadd.f32 %v163_v49, %v162_v44  ;;  %v161_v36 = vadd.f32 %v160_v25, %v159_v14 }
  0x95   :  { %v172_v17 = vrot.slane %v171_v9, 2  ;;  %v200_v30 = vrot.slane %v199_v18, 2 }
  0x96   :  { %v149_v56 = vmul.f32 %v124_v32, %v93_v51  ;;  %v153_v59 = vmul.f32 %v144_v52, %v97_v55  ;;  %v165_v6 = vrot.slane %v164_v58, 2  ;;  %v211_v45 = vpack.c.bf16 %v161_v36, %v161_v36 }
  0x97   :  { %v173_v29 = vadd.f32 %v172_v17, %v171_v9  ;;  %v201_v41 = vadd.f32 %v200_v30, %v199_v18  ;;  %v318_v17 = vld [vmem:[%s448_s5] ss:$0 sm:$0xff] }
  0x98   :  { %v176_v62 = vsel %vm154_vm1, %v149_v56, 0.0  ;;  %v204_v3 = vsel %vm154_vm1, %v153_v59, 0.0  ;;  %v166_v15 = vadd.f32 %v165_v6, %v164_v58  ;;  %v235_v54 = vunpack.c.l.b16 %v211_v45 }
  0x99   :  { %v177_v0 = vrot.slane %v176_v62, 4  ;;  %v80_v1 = vpop.f32.mrf.mxu2  ;;  %v205_v12 = vrot.slane %v204_v3, 4  ;;  %v174_v40 = vrot.slane %v173_v29, 1  ;;  %v202_v50 = vrot.slane %v201_v41, 1 }
  0x9a   :  { %v81_v4 = vadd.f32 %v413_v24, %v80_v1  ;;  %v167_v26 = vrot.slane %v166_v15, 1 }
  0x9b   :  { %v178_v7 = vadd.f32 %v177_v0, %v176_v62  ;;  %v206_v20 = vadd.f32 %v205_v12, %v204_v3  ;;  %v175_v49 = vadd.f32 %v174_v40, %v173_v29  ;;  %v203_v59 = vadd.f32 %v202_v50, %v201_v41 }
  0x9c   :  { %v94_v11 = vmax.f32 %v81_v4, 0.0  ;;  %v168_v37 = vadd.f32 %v167_v26, %v166_v15 }
  0x9d   :  { %v179_v16 = vrot.slane %v178_v7, 2  ;;  %v207_v32 = vrot.slane %v206_v20, 2  ;;  %v213_v58 = vpack.c.bf16 %v175_v49, %v175_v49  ;;  %v217_v3 = vpack.c.bf16 %v203_v59, %v203_v59 }
  0x9e   :  { %v150_v13 = vmul.f32 %v129_v8, %v94_v11  ;;  %v212_v46 = vpack.c.bf16 %v168_v37, %v168_v37 }
  0x9f   :  { %v180_v27 = vadd.f32 %v179_v16, %v178_v7  ;;  %v237_v2 = vunpack.c.l.b16 %v213_v58  ;;  %v241_v10 = vunpack.c.l.b16 %v217_v3 }
  0xa0   :  { %v183_v19 = vsel %vm154_vm1, %v150_v13, 0.0  ;;  %v236_v55 = vunpack.c.l.b16 %v212_v46 }
  0xa1   :  { %v184_v21 = vrot.slane %v183_v19, 4  ;;  %v82_v22 = vpop.f32.mrf.mxu2  ;;  %v181_v38 = vrot.slane %v180_v27, 1 }
  0xa2   :  { %v83_v23 = vadd.f32 %v413_v24, %v82_v22  ;;  %v208_v24 = vadd.f32 %v207_v32, %v206_v20  ;;  %v244_v63 = vsel %vm243_vm2, %v236_v55, %v235_v54 }
  0xa3   :  { %v185_v28 = vadd.f32 %v184_v21, %v183_v19  ;;  %v182_v47 = vadd.f32 %v181_v38, %v180_v27  ;;  %v246_v7 = vsel %vm245_vm3, %v237_v2, %v244_v63 }
  0xa4   :  { %v95_v31 = vmax.f32 %v83_v23, 0.0  ;;  %v209_v52 = vrot.slane %v208_v24, 1 }
  0xa5   :  { %v186_v33 = vrot.slane %v185_v28, 2  ;;  %v214_v56 = vpack.c.bf16 %v182_v47, %v182_v47 }
  0xa6   :  { %v151_v35 = vmul.f32 %v134_v34, %v95_v31  ;;  %v210_v61 = vadd.f32 %v209_v52, %v208_v24 }
  0xa7   :  { %v187_v39 = vadd.f32 %v186_v33, %v185_v28  ;;  %v238_v0 = vunpack.c.l.b16 %v214_v56 }
  0xa8   :  { %v190_v42 = vsel %vm154_vm1, %v151_v35, 0.0  ;;  %v218_v5 = vpack.c.bf16 %v210_v61, %v210_v61 }
  0xa9   :  { %v188_v43 = vrot.slane %v187_v39, 1  ;;  %v191_v44 = vrot.slane %v190_v42, 4  ;;  %v248_v9 = vsel %vm247_vm4, %v238_v0, %v246_v7 }
  0xaa   :  { %v242_v12 = vunpack.c.l.b16 %v218_v5 }
  0xab   :  { %v192_v48 = vadd.f32 %v191_v44, %v190_v42  ;;  %v189_v51 = vadd.f32 %v188_v43, %v187_v39 }
  0xad   :  { %v193_v53 = vrot.slane %v192_v48, 2  ;;  %v215_v60 = vpack.c.bf16 %v189_v51, %v189_v51 }
  0xaf   :  { %v194_v57 = vadd.f32 %v193_v53, %v192_v48  ;;  %v239_v4 = vunpack.c.l.b16 %v215_v60 }
  0xb1   :  { %v195_v62 = vrot.slane %v194_v57, 1  ;;  %v250_v11 = vsel %vm249_vm5, %v239_v4, %v248_v9 }
  0xb3   :  { %v196_v1 = vadd.f32 %v195_v62, %v194_v57 }
  0xb5   :  { %v216_v6 = vpack.c.bf16 %v196_v1, %v196_v1 }
  0xb7   :  { %v240_v8 = vunpack.c.l.b16 %v216_v6 }
  0xb9   :  { %v252_v13 = vsel %vm251_vm6, %v240_v8, %v250_v11 }
  0xba   :  { %v254_v14 = vsel %vm253_vm7, %v241_v10, %v252_v13 }
  0xbb   :  { %v256_v15 = vsel %vm255_vm8, %v242_v12, %v254_v14 }
  0xbc   :  { %v257_v16 = vpack.c.b16 %v256_v15, %v256_v15 }
  0xbe   :  { %307 = vmatmul.msk.bf16.vlgmr.msra.gmra.mxu1 %vm154_vm1, %v257_v16 }
 0x13b   :  { %v282_v18 = vpop.f32.mrf.mxu1 }
 0x13c   :  { %v283_v19 = vadd.f32 %v318_v17, %v282_v18 }
 0x13e   :  { %286 = vst [vmem:[%s450_s6] sm:$0xff] %v283_v19 }
 0x143   :  { %v284_v20 = vpop.f32.mrf.mxu1 }

</bundles_post_ra>
